<compile_context>
chip_gen: v7x
topology: tpu7x:2x2x1
jax: 0.10.0
libtpu: 0.0.40
codegen_flags: <defaults>
</compile_context>

<pallas_src>
import functools

import jax
import jax.numpy as jnp
from jax.experimental import pallas as pl
from jax.experimental.pallas import tpu as pltpu

_LANE = 128
_SUBLANE = 8
_DEFAULT_BLOCK_B = 1024  # serial batch tile; re-derive if raised on v7x (64 MiB VMEM)


def _round_up(x, m):
    return (x + m - 1) // m * m


def _cdiv(a, b):
    return (a + b - 1) // b


def _mlp_kernel(x_ref, w1_ref, w2_ref, o_ref):
    """o = relu(x @ W1 + b1) @ W2a, biases folded into the packed weights.

    w1_ref: (obs+1, HP) = [W1.T ; b1-row]; the bias add happens in-kernel on
    the VPU.  b1-row[hidden] == 1.0, so h keeps a ones column through the ReLU
    and b2 (stored as row `hidden` of w2_ref) is picked up by the second dot.
    """
    obs = x_ref.shape[-1]
    x = x_ref[...].astype(w1_ref.dtype)
    h = jnp.dot(x, w1_ref[:obs, :], preferred_element_type=jnp.float32)
    h = jnp.maximum(h + w1_ref[obs:obs + 1, :].astype(jnp.float32), 0.0)
    o_ref[...] = jnp.dot(
        h.astype(w2_ref.dtype), w2_ref[...], preferred_element_type=jnp.float32
    ).astype(o_ref.dtype)


def prepare_params(w1, b1, w2, b2, *, param_dtype=jnp.float32):
    """One-time packing of PyTorch-layout Linear params (call OUTSIDE the hot loop).

    w1: (hidden, obs), b1: (hidden,), w2: (n_actions, hidden), b2: (n_actions,)

    Returns:
      w1a: (obs+1, HP)  = [W1.T ; b1-row], HP = round_up(hidden+1, 8), with a
                          1.0 at [obs, hidden] (ones column survives the ReLU).
      w2a: (HP, AP)     = [W2.T ; b2-row], action dim zero-padded to 128 lanes.
    """
    hidden, obs = w1.shape
    n_actions = w2.shape[0]
    OP = obs + 1
    HP = _round_up(hidden + 1, _SUBLANE)
    AP = _round_up(max(n_actions, 1), _LANE)

    w1a = jnp.zeros((OP, HP), jnp.float32)
    w1a = w1a.at[:obs, :hidden].set(w1.T.astype(jnp.float32))
    w1a = w1a.at[obs, :hidden].set(b1.astype(jnp.float32))
    w1a = w1a.at[obs, hidden].set(1.0)  # keeps the ones column alive through ReLU

    w2a = jnp.zeros((HP, AP), jnp.float32)
    w2a = w2a.at[:hidden, :n_actions].set(w2.T.astype(jnp.float32))
    w2a = w2a.at[hidden, :n_actions].set(b2.astype(jnp.float32))
    return w1a.astype(param_dtype), w2a.astype(param_dtype)


@functools.partial(jax.jit, static_argnames=("block_b",))
def net_forward_padded(x, w1a, w2a, *, block_b=_DEFAULT_BLOCK_B):
    """Fused forward pass; returns lane-dense padded logits.

    x:   (B, obs) float32 (raw observations — no augmentation needed)
    w1a: (obs+1, HP) from prepare_params
    w2a: (HP, AP)    from prepare_params (AP = 128-padded n_actions)

    Returns (BP, AP) logits.  Real logits are out[:B, :n_actions]; padded
    action columns are exactly 0 for real rows, padded batch rows (only present
    when B > block_b) contain bias garbage — always slice, or use net_forward.
    """
    B, obs = x.shape
    OP, HP = w1a.shape
    HP2, AP = w2a.shape
    assert HP2 == HP and OP == obs + 1

    if B <= block_b:
        # Fast path: single full-array block (full dims bypass the (8,128)
        # rule), grid=(1,), zero wrapper-side padding / extra XLA ops.
        num_tiles, TB, BP = 1, B, B
        x_in = x
    else:
        # Balanced tiling: >=2 steps (v7x 2-TC split), last tile never mostly
        # padding, tiles sublane-aligned.
        B8 = _round_up(B, _SUBLANE)
        num_tiles = max(2, _cdiv(B8, block_b))
        TB = _round_up(_cdiv(B8, num_tiles), _SUBLANE)
        BP = TB * num_tiles
        x_in = x if BP == B else jnp.zeros((BP, obs), x.dtype).at[:B].set(x)

    flops = 2 * BP * HP * (obs + AP)
    bytes_accessed = (
        BP * obs * x.dtype.itemsize
        + OP * HP * w1a.dtype.itemsize
        + HP * AP * w2a.dtype.itemsize
        + BP * AP * 4
    )
    cost = pl.CostEstimate(
        flops=flops, transcendentals=0, bytes_accessed=bytes_accessed
    )

    return pl.pallas_call(
        _mlp_kernel,
        out_shape=jax.ShapeDtypeStruct((BP, AP), jnp.float32),
        grid=(num_tiles,),
        in_specs=[
            pl.BlockSpec((TB, obs), lambda i: (i, 0)),  # batch-tiled activations
            pl.BlockSpec((OP, HP), lambda i: (0, 0)),   # tiny resident weights
            pl.BlockSpec((HP, AP), lambda i: (0, 0)),
        ],
        out_specs=pl.BlockSpec((TB, AP), lambda i: (i, 0)),  # lane-dense stores
        compiler_params=pltpu.CompilerParams(
            dimension_semantics=("parallel",)  # shards across TCs on v7x
        ),
        cost_estimate=cost,
    )(x_in, w1a, w2a)


@functools.partial(jax.jit, static_argnames=("n_actions", "block_b"))
def net_forward(x, w1a, w2a, *, n_actions, block_b=_DEFAULT_BLOCK_B):
    """Safe public API: returns exactly (B, n_actions) logits."""
    out = net_forward_padded(x, w1a, w2a, block_b=block_b)
    return out[: x.shape[0], :n_actions]


def init_params(key, obs_size, hidden_size, n_actions):
    """Deterministic init mimicking nn.Linear's uniform(-1/sqrt(fan_in), ...)."""
    k1, k2, k3, k4 = jax.random.split(key, 4)
    bound1 = 1.0 / jnp.sqrt(obs_size)
    bound2 = 1.0 / jnp.sqrt(hidden_size)
    w1 = jax.random.uniform(k1, (hidden_size, obs_size), jnp.float32, -bound1, bound1)
    b1 = jax.random.uniform(k2, (hidden_size,), jnp.float32, -bound1, bound1)
    w2 = jax.random.uniform(k3, (n_actions, hidden_size), jnp.float32, -bound2, bound2)
    b2 = jax.random.uniform(k4, (n_actions,), jnp.float32, -bound2, bound2)
    return w1, b1, w2, b2


if __name__ == "__main__":
    # CartPole-like sizes: obs_size=4, hidden_size=32, n_actions=2.
    obs_size, hidden_size, n_actions = 4, 32, 2

    key = jax.random.PRNGKey(0)
    kx, kp, kx2 = jax.random.split(key, 3)
    w1, b1, w2, b2 = init_params(kp, obs_size, hidden_size, n_actions)

    # One-time parameter packing (hoisted out of the per-step path).
    w1a, w2a = prepare_params(w1, b1, w2, b2)

    def reference(xin):
        return jnp.maximum(xin @ w1.T + b1, 0.0) @ w2.T + b2

    # --- Small-batch fast path (grid=(1,), no padding, no extra XLA ops). ---
    batch = 8
    x = jax.random.normal(kx, (batch, obs_size), jnp.float32)
    out = net_forward(x, w1a, w2a, n_actions=n_actions)
    jax.block_until_ready(out)
    assert out.shape == (batch, n_actions)
    assert jnp.allclose(out, reference(x), atol=1e-5, rtol=1e-5)

    # Padded action lanes of the raw kernel output must be exactly zero.
    out_padded = net_forward_padded(x, w1a, w2a)
    jax.block_until_ready(out_padded)
    assert jnp.allclose(out_padded[:batch, :n_actions], reference(x), atol=1e-5, rtol=1e-5)
    assert jnp.all(out_padded[:batch, n_actions:] == 0.0)

    # --- Large-batch tiled path (balanced >=2 tiles, batch padding). ---
    big_batch = 300
    xb = jax.random.normal(kx2, (big_batch, obs_size), jnp.float32)
    out_big = net_forward(xb, w1a, w2a, n_actions=n_actions, block_b=128)
    jax.block_until_ready(out_big)
    assert out_big.shape == (big_batch, n_actions)
    assert jnp.allclose(out_big, reference(xb), atol=1e-5, rtol=1e-5)

    print("KERNEL_OK")
</pallas_src>

<mosaic_0001>
module attributes {stable_mosaic.version = 11 : i64} {
  func.func @_mlp_kernel(%arg0: i32, %arg1: memref<8x4xf32, #tpu.memory_space<vmem>>, %arg2: memref<5x40xf32, #tpu.memory_space<vmem>>, %arg3: memref<40x128xf32, #tpu.memory_space<vmem>>, %arg4: memref<8x128xf32, #tpu.memory_space<vmem>>) attributes {dimension_semantics = [#tpu.dimension_semantics<parallel>], iteration_bounds = array<i64: 1>, scalar_prefetch = 0 : i64, scratch_operands = 0 : i64, tpu.core_type = #tpu.core_type<tc>, window_params = [{transform_indices = @transform_0, window_bounds = array<i64: 8, 4>}, {pipeline_mode = #tpu.pipeline_mode<synchronous>, transform_indices = @transform_1, window_bounds = array<i64: 5, 40>}, {pipeline_mode = #tpu.pipeline_mode<synchronous>, transform_indices = @transform_2, window_bounds = array<i64: 40, 128>}, {transform_indices = @transform_3, window_bounds = array<i64: 8, 128>}]} {
    %c0 = arith.constant 0 : index
    %c0_0 = arith.constant 0 : index
    %0 = vector.load %arg1[%c0, %c0_0] : memref<8x4xf32, #tpu.memory_space<vmem>>, vector<8x4xf32>
    %c0_1 = arith.constant 0 : index
    %c0_2 = arith.constant 0 : index
    %1 = vector.load %arg2[%c0_1, %c0_2] : memref<5x40xf32, #tpu.memory_space<vmem>>, vector<4x40xf32>
    %cst = arith.constant dense<0.000000e+00> : vector<8x40xf32>
    %2 = tpu.matmul %0, %1, %cst {dimension_numbers = #tpu.dot_dimension_numbers<[1], [0], [0], [1], [0, 0, 1, 1], [], []>} : vector<8x4xf32>, vector<4x40xf32>, vector<8x40xf32> -> vector<8x40xf32>
    %c4 = arith.constant 4 : index
    %c0_3 = arith.constant 0 : index
    %3 = vector.load %arg2[%c4, %c0_3] : memref<5x40xf32, #tpu.memory_space<vmem>>, vector<1x40xf32>
    %4 = vector.broadcast %3 : vector<1x40xf32> to vector<8x40xf32>
    %5 = arith.addf %2, %4 : vector<8x40xf32>
    %cst_4 = arith.constant 0.000000e+00 : f32
    %6 = vector.broadcast %cst_4 : f32 to vector<8x40xf32>
    %7 = arith.maximumf %5, %6 : vector<8x40xf32>
    %c0_5 = arith.constant 0 : index
    %c0_6 = arith.constant 0 : index
    %8 = vector.load %arg3[%c0_5, %c0_6] : memref<40x128xf32, #tpu.memory_space<vmem>>, vector<40x128xf32>
    %cst_7 = arith.constant dense<0.000000e+00> : vector<8x128xf32>
    %9 = tpu.matmul %7, %8, %cst_7 {dimension_numbers = #tpu.dot_dimension_numbers<[1], [0], [0], [1], [0, 0, 1, 1], [], []>} : vector<8x40xf32>, vector<40x128xf32>, vector<8x128xf32> -> vector<8x128xf32>
    %c0_8 = arith.constant 0 : index
    %c0_9 = arith.constant 0 : index
    %10 = vector.load %arg4[%c0_8, %c0_9] : memref<8x128xf32, #tpu.memory_space<vmem>>, vector<8x128xf32>
    tpu.vector_store %arg4[%c0_8, %c0_9], %9 {strides = array<i32>} : memref<8x128xf32, #tpu.memory_space<vmem>>, vector<8x128xf32>,
    return
  }
  func.func @transform_0(%arg0: i32) -> (i32, i32) {
    %c0_i32 = arith.constant 0 : i32
    %c0_i32_0 = arith.constant 0 : i32
    return %arg0, %c0_i32 : i32, i32
  }
  func.func @transform_1(%arg0: i32) -> (i32, i32) {
    %c0_i32 = arith.constant 0 : i32
    %c0_i32_0 = arith.constant 0 : i32
    %c0_i32_1 = arith.constant 0 : i32
    return %c0_i32, %c0_i32_0 : i32, i32
  }
  func.func @transform_2(%arg0: i32) -> (i32, i32) {
    %c0_i32 = arith.constant 0 : i32
    %c0_i32_0 = arith.constant 0 : i32
    %c0_i32_1 = arith.constant 0 : i32
    return %c0_i32, %c0_i32_0 : i32, i32
  }
  func.func @transform_3(%arg0: i32) -> (i32, i32) {
    %c0_i32 = arith.constant 0 : i32
    %c0_i32_0 = arith.constant 0 : i32
    return %arg0, %c0_i32 : i32, i32
  }
}

</mosaic_0001>

<bundles_post_ra>
// kernel: net_forward_padded.1
= control target key start
LH: loop header
LB: loop body
LE: loop exit
PB: predicated region body
PF: predicated region fallthrough
CT: control target
= control target key end

     0   :  { %8 = vsyncpa [#allocation3], 0  ;;  %s361_s0 = inlined_call_operand.vmem [shape: f32[8,4], index: 0, kind: input, shape index: {}]   ;;  %s362_s1 = inlined_call_operand.vmem [shape: f32[5,40], index: 1, kind: input, shape index: {}]   ;;  %s363_s2 = inlined_call_operand.hbm [shape: f32[40,128], index: 2, kind: input, shape index: {}]   ;;  %s364_s3 = inlined_call_operand.hbm [shape: f32[8,128], index: 3, kind: output, shape index: {}]  }
   0x1   :  { %9 = vsyncpa [#allocation4], 0  ;;  %s301_s12 = smov [#allocation2]   ;;  %s253_s16 = scalar_lea.hbm %s363_s2, 640 }
   0x2   :  { %s19_s13 = sshll.u32 %s301_s12, 4  ;;  %p254_p0 = scmp.ne.s32.totalorder %s363_s2, %s253_s16  ;;  %s20_s13 = int_to_ptr.vmem [resolvable:$true] %s19_s13 }
   0x3   :  { %p257_p1 = scmp.lt.u32.totalorder %s253_s16, %s363_s2 }
   0x5   :  { %p259_p2 = pnand %p257_p1, %p254_p0 }
   0x7   :  { %262 = shalt.err (!%p259_p2)
}
   0x8   :  { %s263_s21 = scalar_lea.vmem %s20_s13, 640  ;;  %p268_p4 = scmp.lt.s32.totalorder %s20_s13, %s20_s13 }
   0x9   :  { %p264_p3 = scmp.ne.s32.totalorder %s20_s13, %s263_s21  ;;  %p269_p5 = scmp.lt.s32.totalorder %s263_s21, %s263_s21 }
   0xb   :  { %p270_p6 = por %p269_p5, %p268_p4 }
   0xd   :  { %p271_p7 = pnand %p270_p6, %p264_p3 }
   0xf   :  { %274 = shalt.err (!%p271_p7)
}
  0x10   :  { %s302_s22 = smov 128   ;;  %s303_s23 = smov 8  }
  0x11   :  { %25 = dma.hbm_to_vmem [thread:$0]  %s363_s2, 640, %s20_s13, [#allocation3], %s302_s22, %s302_s22, %s303_s23  }
  0x12   :  { %297 = dma.done.wait [#allocation3], 640  }
  0x13   :  { %298 = vsyncadd [#allocation3], 4294966656  ;;  %v304_v0 = vmov 0.0   ;;  %vm305_vm0 = vmmov 0   ;;  %v306_v1 = vmov 0.0|0.0   ;;  %vm40_vm1 = vcmask 1043456  }
  0x14   :  { %222 = vmatprep.subr.mxu0 %v304_v0  ;;  %224 = vmatprep.mubr.msk.f32.mxu0 %vm305_vm0, %v304_v0  ;;  %vm36_vm2 = vcmask 31744   ;;  %v30_v2 = vld [vmem:[%s362_s1] sm:$0xf]  ;;  %v115_v4 = vld [vmem:[#allocation2] sm:$0xff]  ;;  %v116_v5 = vld [vmem:[#allocation2 + $0x8] sm:$0xff]  ;;  %vm120_vm3 = vcmask 326656  }
  0x15   :  { %240 = vmatprep.subr.bf16.mxu1 %v306_v1  ;;  %237 = vmatprep.mubr.msk.f32.mxu1 %vm305_vm0, %v304_v0  ;;  %v29_v3 = vld [vmem:[%s361_s0] sm:$0xff]  ;;  %v241_v6 = vpack.c.bf16 %v116_v5, %v115_v4  ;;  %v118_v8 = vld [vmem:[#allocation2 + $0x18] sm:$0xff]  ;;  %v119_v10 = vld [vmem:[#allocation2 + $0x20] sm:$0xff]  ;;  %s307_s0 = smov [#allocation5]  }
  0x16   :  { %223 = vmatpush3.msk.msra.mxu0 %vm40_vm1, %v30_v2  ;;  %v117_v7 = vld [vmem:[#allocation2 + $0x10] sm:$0xff]  ;;  %s201_s4 = sshll.u32 %s307_s0, 4  ;;  %s202_s4 = int_to_ptr.vmem [resolvable:$true] %s201_s4 }
  0x17   :  { %225 = vmatmul.mubr.msk.f32.vlgmr.msra.gmra.mrb[0].mxu0 %vm36_vm2, %v29_v3  ;;  %242 = vmatpush3.bf16.msra.mxu1 %v241_v6  ;;  %v244_v9 = vpack.c.bf16 %v118_v8, %v117_v7  ;;  %v210_v11 = vld [vmem:[%s362_s1 + $0x4] ss:$0 sm:$0xff]  ;;  %s275_s5 = scalar_lea.vmem %s202_s4, 128  ;;  %p280_p9 = scmp.lt.s32.totalorder %s202_s4, %s202_s4 }
  0x18   :  { %243 = vmatprep.subr.bf16.mxu1 %v306_v1  ;;  %p276_p8 = scmp.ne.s32.totalorder %s202_s4, %s275_s5  ;;  %p281_p10 = scmp.lt.s32.totalorder %s275_s5, %s275_s5 }
  0x1a   :  { %p282_p11 = por %p281_p10, %p280_p9 }
  0x1b   :  { %245 = vmatpush3.bf16.msra.mxu1 %v244_v9 }
  0x1c   :  { %235 = vmatprep.subr.mxu1 %v304_v0  ;;  %p283_p12 = pnand %p282_p11, %p276_p8 }
  0x1f   :  { %236 = vmatpush3.msra.mxu1 %v119_v10 }
  0xea   :  { %v110_v12 = vpop.f32.mrb[0].mxu0 }
  0xeb   :  { %v111_v13 = vadd.f32 %v210_v11, %v110_v12  ;;  %v226_v14 = vpop.f32.mrb[1].mxu0 }
  0xed   :  { %v114_v15 = vmax.f32 %v111_v13, 0.0 }
  0xef   :  { %238 = vmatmul.mubr.msk.f32.vlgmr.msra.gmra.mrb[0].mxu1 %vm120_vm3, %v114_v15 }
 0x1c2   :  { %v190_v16 = vpop.f32.mrb[0].mxu1 }
 0x1c3   :  { %194 = vst [vmem:[#allocation5] sm:$0xff] %v190_v16  ;;  %v239_v17 = vpop.f32.mrb[1].mxu1 }
 0x1c4   :  { %286 = shalt.err (!%p283_p12)
}
 0x1c5   :  { %s287_s7 = scalar_lea.hbm %s364_s3, 128 }
 0x1c6   :  { %p288_p13 = scmp.ne.s32.totalorder %s364_s3, %s287_s7  ;;  %p291_p0 = scmp.lt.u32.totalorder %s287_s7, %s364_s3 }
 0x1c8   :  { %p293_p1 = pnand %p291_p0, %p288_p13 }
 0x1ca   :  { %296 = shalt.err (!%p293_p1)
}
 0x1cb   :  { %204 = dma.vmem_to_hbm [thread:$0]  %s202_s4, 128, %s364_s3, [#allocation4]  }
 0x1cc   :  { %299 = dma.done.wait [#allocation4], 128  }
 0x1cd   :  { %300 = vsyncadd [#allocation4], 4294967168 }
 0x1ce   :  { %208 = vsyncpa [#allocation3], 1 }
 0x1cf   :  { %209 = vsyncpa [#allocation4], 1 }

</bundles_post_ra>
